<compile_context>
chip_gen: v7x
topology: tpu7x:2x2x1
jax: 0.10.0
libtpu: 0.0.40
codegen_flags: <defaults>
</compile_context>

<pallas_src>
import functools

import jax
import jax.numpy as jnp
import numpy as np
from jax.experimental import pallas as pl
from jax.experimental.pallas import tpu as pltpu


def _round_up(n, m):
    return ((n + m - 1) // m) * m


# ---------------- fused per-image Pallas kernel ----------------

def encoder_kernel(p1_ref, w1_ref, b1_ref, g_ref, w2_ref, b2_ref, o_ref, *,
                   s2, s2_pad, c1, c2, nk2, out_pad):
    # ---- conv1: (S1p, K1) @ (K1, C1) + bias, ReLU (MXU, f32 accumulation) ---
    y1 = jnp.dot(p1_ref[...], w1_ref[...], preferred_element_type=jnp.float32)
    y1 = jnp.maximum(y1 + b1_ref[...], 0.0).astype(jnp.bfloat16)    # (S1p, C1)

    # ---- conv2 patch gather: ONE stacked 0/1 selection matmul ---------------
    # Row (k*s2_pad + s) of g picks the conv1 activation feeding conv2 output
    # pixel s at kernel offset k; all-zero rows encode ZeroPad2d(1) and the
    # 9 -> 16 row padding.  Selecting bf16 values this way is exact.
    p = jnp.dot(g_ref[...], y1, preferred_element_type=jnp.float32)
    p = p.astype(jnp.bfloat16)                                      # (9*16, C1)

    # ---- conv2: accumulated sum of per-offset matmuls (no lane concat) ------
    # Slices start at multiples of 16 (rows) / 32 (weight rows): sublane-aligned.
    acc = jnp.zeros((s2_pad, c2), jnp.float32)
    for k in range(nk2):
        acc = acc + jnp.dot(p[k * s2_pad:(k + 1) * s2_pad, :],
                            w2_ref[k * c1:(k + 1) * c1, :],
                            preferred_element_type=jnp.float32)

    # bias + ReLU; zero the padded rows (true S2 rows only)
    row_ids = jax.lax.broadcasted_iota(jnp.int32, (s2_pad, 1), 0)
    mask = (row_ids < s2).astype(jnp.float32)
    y2 = jnp.maximum(acc + b2_ref[...], 0.0) * mask                 # (16, C2) f32

    # ---- stats over the true S2 spatial rows (sublane axis, vectorized) -----
    inv_n = 1.0 / s2
    bessel = 1.0 / max(s2 - 1, 1)                    # torch unbiased std (N-1)
    mean = jnp.sum(y2, axis=0, keepdims=True) * inv_n               # (1, C2)
    diff = (y2 - mean) * mask                        # padded rows contribute 0
    var = jnp.sum(diff * diff, axis=0, keepdims=True) * bessel
    std = jnp.sqrt(var)
    mx = jnp.max(y2, axis=0, keepdims=True)          # ReLU >= 0, pad rows safe

    pieces = [std, mean, mx]
    if out_pad > 3 * c2:
        pieces.append(jnp.zeros((1, out_pad - 3 * c2), jnp.float32))
    o_ref[...] = jnp.concatenate(pieces, axis=1)     # lane-dense (1, out_pad)


# ---------------- trace-time prep (tiny, one-shot) ----------------

def _im2col_gather(x_pad, k, stride, oh, ow):
    """x_pad: (B, C, Hp, Wp).  Returns (B, oh*ow, C*k*k) patches with feature
    order (C, kh, kw) matching torch's weight.reshape(Cout, -1)."""
    b, c = x_pad.shape[0], x_pad.shape[1]
    rows = stride * jnp.arange(oh)[:, None] + jnp.arange(k)[None, :]    # (oh, k)
    cols = stride * jnp.arange(ow)[:, None] + jnp.arange(k)[None, :]    # (ow, k)
    p = x_pad[:, :, rows[:, :, None, None], cols[None, None, :, :]]     # (b,c,oh,k,ow,k)
    p = p.transpose(0, 2, 4, 1, 3, 5).reshape(b, oh * ow, c * k * k)
    return p


def _conv2_gather_matrix(oh1, ow1, s1_pad, k, stride, pad, s2_pad):
    """Per-image constant 0/1 matrix (k*k*s2_pad, s1_pad): row (kk*s2_pad + s)
    selects the conv1 activation feeding conv2 output pixel s at offset kk;
    all-zero rows encode ZeroPad2d(1) and the s2 -> s2_pad row padding."""
    oh2 = (oh1 + 2 * pad - k) // stride + 1
    ow2 = (ow1 + 2 * pad - k) // stride + 1
    g = np.zeros((k * k * s2_pad, s1_pad), np.float32)
    for kh in range(k):
        for kw in range(k):
            kk = kh * k + kw
            for oy in range(oh2):
                for ox in range(ow2):
                    iy = stride * oy + kh - pad
                    ix = stride * ox + kw - pad
                    if 0 <= iy < oh1 and 0 <= ix < ow1:
                        g[kk * s2_pad + oy * ow2 + ox, iy * ow1 + ix] = 1.0
    return g, oh2, ow2


def encoder_forward(x, w1, b1, w2, b2):
    b, cin, h, w = x.shape
    c1, c2 = w1.shape[0], w2.shape[0]
    k1, k2, stride = 7, 3, 2

    # conv1 im2col (ZeroPad2d(1) + single gather); rows padded to a sublane
    # multiple -- the padded rows are never selected by the conv2 gather matrix.
    xp = jnp.pad(x, ((0, 0), (0, 0), (1, 1), (1, 1)))
    oh1 = (h + 2 - k1) // stride + 1
    ow1 = (w + 2 - k1) // stride + 1
    s1, feat1 = oh1 * ow1, cin * k1 * k1
    s1p = _round_up(s1, 8)
    p1 = _im2col_gather(xp, k1, stride, oh1, ow1)                  # (B, S1, feat1)
    p1 = jnp.pad(p1, ((0, 0), (0, s1p - s1), (0, 0))).astype(jnp.bfloat16)
    w1m = w1.reshape(c1, feat1).T.astype(jnp.bfloat16)             # (feat1, C1)

    # conv2: stacked per-image gather matrix + (kh, kw, cin)-ordered weights.
    nk2 = k2 * k2
    oh2 = (oh1 + 2 - k2) // stride + 1
    ow2 = (ow1 + 2 - k2) // stride + 1
    s2 = oh2 * ow2
    s2p = _round_up(s2, 8)
    g_np, _, _ = _conv2_gather_matrix(oh1, ow1, s1p, k2, stride, 1, s2p)
    g = jnp.asarray(g_np, jnp.bfloat16)                            # (9*s2p, s1p)
    w2cat = w2.transpose(2, 3, 1, 0).reshape(nk2 * c1, c2).astype(jnp.bfloat16)

    out_pad = _round_up(3 * c2, 128)
    kernel = functools.partial(encoder_kernel, s2=s2, s2_pad=s2p, c1=c1, c2=c2,
                               nk2=nk2, out_pad=out_pad)

    flops = 2 * b * (s1p * feat1 * c1 + nk2 * s2p * s1p * c1 + nk2 * s2p * c1 * c2)
    bytes_accessed = int(p1.size * 2 + w1m.size * 2 + g.size * 2 + w2cat.size * 2
                         + 4 * (c1 + c2) + 4 * b * out_pad)

    res = pl.pallas_call(
        kernel,
        out_shape=jax.ShapeDtypeStruct((b, 1, out_pad), jnp.float32),
        grid=(b,),
        in_specs=[
            pl.BlockSpec((None, s1p, feat1), lambda i: (i, 0, 0)),   # per-image patches
            pl.BlockSpec((feat1, c1), lambda i: (0, 0)),             # conv1 weight
            pl.BlockSpec((1, c1), lambda i: (0, 0)),                 # conv1 bias (f32)
            pl.BlockSpec((nk2 * s2p, s1p), lambda i: (0, 0)),        # stacked gather
            pl.BlockSpec((nk2 * c1, c2), lambda i: (0, 0)),          # conv2 weight
            pl.BlockSpec((1, c2), lambda i: (0, 0)),                 # conv2 bias (f32)
        ],
        out_specs=pl.BlockSpec((None, 1, out_pad), lambda i: (i, 0, 0)),
        compiler_params=pltpu.CompilerParams(dimension_semantics=("parallel",)),
        cost_estimate=pl.CostEstimate(flops=flops, transcendentals=b * c2,
                                      bytes_accessed=bytes_accessed),
    )(p1, w1m,
      b1.reshape(1, c1).astype(jnp.float32),
      g, w2cat,
      b2.reshape(1, c2).astype(jnp.float32))

    # TODO(synk): at realistic H/W, additionally tile conv1 rows over a second
    # grid axis and set vmem_limit_bytes; unnecessary at these sizes.
    return res[:, 0, :3 * c2]                       # (B, 3*C2) = [std | mean | max]


if __name__ == "__main__":
    key = jax.random.PRNGKey(0)
    k_x, k_w1, k_b1, k_w2, k_b2 = jax.random.split(key, 5)

    B, in_nc, H, W = 2, 3, 16, 16
    encode_nf = 32

    x = jax.random.normal(k_x, (B, in_nc, H, W), jnp.float32)
    # Deterministic synthetic parameters (shapes from nn.Conv2d in __init__).
    w1 = 0.05 * jax.random.normal(k_w1, (encode_nf, in_nc, 7, 7), jnp.float32)
    b1 = 0.05 * jax.random.normal(k_b1, (encode_nf,), jnp.float32)
    w2 = 0.05 * jax.random.normal(k_w2, (encode_nf, encode_nf, 3, 3), jnp.float32)
    b2 = 0.05 * jax.random.normal(k_b2, (encode_nf,), jnp.float32)

    out = jax.jit(encoder_forward)(x, w1, b1, w2, b2)
    jax.block_until_ready(out)
    assert out.shape == (B, 3 * encode_nf), out.shape
    assert bool(jnp.all(jnp.isfinite(out)))
    print("KERNEL_OK")
</pallas_src>

<mosaic_0001>
module attributes {stable_mosaic.version = 11 : i64} {
  func.func @encoder_kernel(%arg0: i32, %arg1: memref<1x40x147xbf16, #tpu.memory_space<vmem>>, %arg2: memref<147x32xbf16, #tpu.memory_space<vmem>>, %arg3: memref<1x32xf32, #tpu.memory_space<vmem>>, %arg4: memref<144x40xbf16, #tpu.memory_space<vmem>>, %arg5: memref<288x32xbf16, #tpu.memory_space<vmem>>, %arg6: memref<1x32xf32, #tpu.memory_space<vmem>>, %arg7: memref<1x1x128xf32, #tpu.memory_space<vmem>>) attributes {dimension_semantics = [#tpu.dimension_semantics<parallel>], iteration_bounds = array<i64: 2>, scalar_prefetch = 0 : i64, scratch_operands = 0 : i64, tpu.core_type = #tpu.core_type<tc>, window_params = [{transform_indices = @transform_0, window_bounds = array<i64: 1, 40, 147>}, {pipeline_mode = #tpu.pipeline_mode<synchronous>, transform_indices = @transform_1, window_bounds = array<i64: 147, 32>}, {pipeline_mode = #tpu.pipeline_mode<synchronous>, transform_indices = @transform_2, window_bounds = array<i64: 1, 32>}, {pipeline_mode = #tpu.pipeline_mode<synchronous>, transform_indices = @transform_3, window_bounds = array<i64: 144, 40>}, {pipeline_mode = #tpu.pipeline_mode<synchronous>, transform_indices = @transform_4, window_bounds = array<i64: 288, 32>}, {pipeline_mode = #tpu.pipeline_mode<synchronous>, transform_indices = @transform_5, window_bounds = array<i64: 1, 32>}, {transform_indices = @transform_6, window_bounds = array<i64: 1, 1, 128>}]} {
    %c0 = arith.constant 0 : index
    %c0_0 = arith.constant 0 : index
    %c0_1 = arith.constant 0 : index
    %0 = vector.load %arg1[%c0, %c0_0, %c0_1] : memref<1x40x147xbf16, #tpu.memory_space<vmem>>, vector<1x40x147xbf16>
    %1 = vector.shape_cast %0 : vector<1x40x147xbf16> to vector<40x147xbf16>
    %c0_2 = arith.constant 0 : index
    %c0_3 = arith.constant 0 : index
    %2 = vector.load %arg2[%c0_2, %c0_3] : memref<147x32xbf16, #tpu.memory_space<vmem>>, vector<147x32xbf16>
    %cst = arith.constant dense<0.000000e+00> : vector<40x32xf32>
    %3 = tpu.matmul %1, %2, %cst {dimension_numbers = #tpu.dot_dimension_numbers<[1], [0], [0], [1], [0, 0, 1, 1], [], []>} : vector<40x147xbf16>, vector<147x32xbf16>, vector<40x32xf32> -> vector<40x32xf32>
    %c0_4 = arith.constant 0 : index
    %c0_5 = arith.constant 0 : index
    %4 = vector.load %arg3[%c0_4, %c0_5] : memref<1x32xf32, #tpu.memory_space<vmem>>, vector<1x32xf32>
    %5 = vector.broadcast %4 : vector<1x32xf32> to vector<40x32xf32>
    %6 = arith.addf %3, %5 : vector<40x32xf32>
    %cst_6 = arith.constant 0.000000e+00 : f32
    %7 = vector.broadcast %cst_6 : f32 to vector<40x32xf32>
    %8 = arith.maximumf %6, %7 : vector<40x32xf32>
    %9 = arith.truncf %8 : vector<40x32xf32> to vector<40x32xbf16>
    %c0_7 = arith.constant 0 : index
    %c0_8 = arith.constant 0 : index
    %10 = vector.load %arg4[%c0_7, %c0_8] : memref<144x40xbf16, #tpu.memory_space<vmem>>, vector<144x40xbf16>
    %cst_9 = arith.constant dense<0.000000e+00> : vector<144x32xf32>
    %11 = tpu.matmul %10, %9, %cst_9 {dimension_numbers = #tpu.dot_dimension_numbers<[1], [0], [0], [1], [0, 0, 1, 1], [], []>} : vector<144x40xbf16>, vector<40x32xbf16>, vector<144x32xf32> -> vector<144x32xf32>
    %12 = arith.truncf %11 : vector<144x32xf32> to vector<144x32xbf16>
    %cst_10 = arith.constant 0.000000e+00 : f32
    %13 = vector.broadcast %cst_10 : f32 to vector<16x32xf32>
    %14 = vector.extract_strided_slice %12 {offsets = [0, 0], sizes = [16, 32], strides = [1, 1]} : vector<144x32xbf16> to vector<16x32xbf16>
    %c0_11 = arith.constant 0 : index
    %c0_12 = arith.constant 0 : index
    %15 = vector.load %arg5[%c0_11, %c0_12] : memref<288x32xbf16, #tpu.memory_space<vmem>>, vector<32x32xbf16>
    %cst_13 = arith.constant dense<0.000000e+00> : vector<16x32xf32>
    %16 = tpu.matmul %14, %15, %cst_13 {dimension_numbers = #tpu.dot_dimension_numbers<[1], [0], [0], [1], [0, 0, 1, 1], [], []>} : vector<16x32xbf16>, vector<32x32xbf16>, vector<16x32xf32> -> vector<16x32xf32>
    %17 = arith.addf %13, %16 : vector<16x32xf32>
    %18 = vector.extract_strided_slice %12 {offsets = [16, 0], sizes = [16, 32], strides = [1, 1]} : vector<144x32xbf16> to vector<16x32xbf16>
    %c32 = arith.constant 32 : index
    %c0_14 = arith.constant 0 : index
    %19 = vector.load %arg5[%c32, %c0_14] : memref<288x32xbf16, #tpu.memory_space<vmem>>, vector<32x32xbf16>
    %cst_15 = arith.constant dense<0.000000e+00> : vector<16x32xf32>
    %20 = tpu.matmul %18, %19, %cst_15 {dimension_numbers = #tpu.dot_dimension_numbers<[1], [0], [0], [1], [0, 0, 1, 1], [], []>} : vector<16x32xbf16>, vector<32x32xbf16>, vector<16x32xf32> -> vector<16x32xf32>
    %21 = arith.addf %17, %20 : vector<16x32xf32>
    %22 = vector.extract_strided_slice %12 {offsets = [32, 0], sizes = [16, 32], strides = [1, 1]} : vector<144x32xbf16> to vector<16x32xbf16>
    %c64 = arith.constant 64 : index
    %c0_16 = arith.constant 0 : index
    %23 = vector.load %arg5[%c64, %c0_16] : memref<288x32xbf16, #tpu.memory_space<vmem>>, vector<32x32xbf16>
    %cst_17 = arith.constant dense<0.000000e+00> : vector<16x32xf32>
    %24 = tpu.matmul %22, %23, %cst_17 {dimension_numbers = #tpu.dot_dimension_numbers<[1], [0], [0], [1], [0, 0, 1, 1], [], []>} : vector<16x32xbf16>, vector<32x32xbf16>, vector<16x32xf32> -> vector<16x32xf32>
    %25 = arith.addf %21, %24 : vector<16x32xf32>
    %26 = vector.extract_strided_slice %12 {offsets = [48, 0], sizes = [16, 32], strides = [1, 1]} : vector<144x32xbf16> to vector<16x32xbf16>
    %c96 = arith.constant 96 : index
    %c0_18 = arith.constant 0 : index
    %27 = vector.load %arg5[%c96, %c0_18] : memref<288x32xbf16, #tpu.memory_space<vmem>>, vector<32x32xbf16>
    %cst_19 = arith.constant dense<0.000000e+00> : vector<16x32xf32>
    %28 = tpu.matmul %26, %27, %cst_19 {dimension_numbers = #tpu.dot_dimension_numbers<[1], [0], [0], [1], [0, 0, 1, 1], [], []>} : vector<16x32xbf16>, vector<32x32xbf16>, vector<16x32xf32> -> vector<16x32xf32>
    %29 = arith.addf %25, %28 : vector<16x32xf32>
    %30 = vector.extract_strided_slice %12 {offsets = [64, 0], sizes = [16, 32], strides = [1, 1]} : vector<144x32xbf16> to vector<16x32xbf16>
    %c128 = arith.constant 128 : index
    %c0_20 = arith.constant 0 : index
    %31 = vector.load %arg5[%c128, %c0_20] : memref<288x32xbf16, #tpu.memory_space<vmem>>, vector<32x32xbf16>
    %cst_21 = arith.constant dense<0.000000e+00> : vector<16x32xf32>
    %32 = tpu.matmul %30, %31, %cst_21 {dimension_numbers = #tpu.dot_dimension_numbers<[1], [0], [0], [1], [0, 0, 1, 1], [], []>} : vector<16x32xbf16>, vector<32x32xbf16>, vector<16x32xf32> -> vector<16x32xf32>
    %33 = arith.addf %29, %32 : vector<16x32xf32>
    %34 = vector.extract_strided_slice %12 {offsets = [80, 0], sizes = [16, 32], strides = [1, 1]} : vector<144x32xbf16> to vector<16x32xbf16>
    %c160 = arith.constant 160 : index
    %c0_22 = arith.constant 0 : index
    %35 = vector.load %arg5[%c160, %c0_22] : memref<288x32xbf16, #tpu.memory_space<vmem>>, vector<32x32xbf16>
    %cst_23 = arith.constant dense<0.000000e+00> : vector<16x32xf32>
    %36 = tpu.matmul %34, %35, %cst_23 {dimension_numbers = #tpu.dot_dimension_numbers<[1], [0], [0], [1], [0, 0, 1, 1], [], []>} : vector<16x32xbf16>, vector<32x32xbf16>, vector<16x32xf32> -> vector<16x32xf32>
    %37 = arith.addf %33, %36 : vector<16x32xf32>
    %38 = vector.extract_strided_slice %12 {offsets = [96, 0], sizes = [16, 32], strides = [1, 1]} : vector<144x32xbf16> to vector<16x32xbf16>
    %c192 = arith.constant 192 : index
    %c0_24 = arith.constant 0 : index
    %39 = vector.load %arg5[%c192, %c0_24] : memref<288x32xbf16, #tpu.memory_space<vmem>>, vector<32x32xbf16>
    %cst_25 = arith.constant dense<0.000000e+00> : vector<16x32xf32>
    %40 = tpu.matmul %38, %39, %cst_25 {dimension_numbers = #tpu.dot_dimension_numbers<[1], [0], [0], [1], [0, 0, 1, 1], [], []>} : vector<16x32xbf16>, vector<32x32xbf16>, vector<16x32xf32> -> vector<16x32xf32>
    %41 = arith.addf %37, %40 : vector<16x32xf32>
    %42 = vector.extract_strided_slice %12 {offsets = [112, 0], sizes = [16, 32], strides = [1, 1]} : vector<144x32xbf16> to vector<16x32xbf16>
    %c224 = arith.constant 224 : index
    %c0_26 = arith.constant 0 : index
    %43 = vector.load %arg5[%c224, %c0_26] : memref<288x32xbf16, #tpu.memory_space<vmem>>, vector<32x32xbf16>
    %cst_27 = arith.constant dense<0.000000e+00> : vector<16x32xf32>
    %44 = tpu.matmul %42, %43, %cst_27 {dimension_numbers = #tpu.dot_dimension_numbers<[1], [0], [0], [1], [0, 0, 1, 1], [], []>} : vector<16x32xbf16>, vector<32x32xbf16>, vector<16x32xf32> -> vector<16x32xf32>
    %45 = arith.addf %41, %44 : vector<16x32xf32>
    %46 = vector.extract_strided_slice %12 {offsets = [128, 0], sizes = [16, 32], strides = [1, 1]} : vector<144x32xbf16> to vector<16x32xbf16>
    %c256 = arith.constant 256 : index
    %c0_28 = arith.constant 0 : index
    %47 = vector.load %arg5[%c256, %c0_28] : memref<288x32xbf16, #tpu.memory_space<vmem>>, vector<32x32xbf16>
    %cst_29 = arith.constant dense<0.000000e+00> : vector<16x32xf32>
    %48 = tpu.matmul %46, %47, %cst_29 {dimension_numbers = #tpu.dot_dimension_numbers<[1], [0], [0], [1], [0, 0, 1, 1], [], []>} : vector<16x32xbf16>, vector<32x32xbf16>, vector<16x32xf32> -> vector<16x32xf32>
    %49 = arith.addf %45, %48 : vector<16x32xf32>
    %50 = tpu.iota {dimensions = array<i32: 0>} : vector<16x1xi32>
    %c9_i32 = arith.constant 9 : i32
    %51 = vector.broadcast %c9_i32 : i32 to vector<16x1xi32>
    %52 = arith.cmpi slt, %50, %51 : vector<16x1xi32>
    %53 = arith.extui %52 : vector<16x1xi1> to vector<16x1xi32>
    %54 = arith.sitofp %53 : vector<16x1xi32> to vector<16x1xf32>
    %c0_30 = arith.constant 0 : index
    %c0_31 = arith.constant 0 : index
    %55 = vector.load %arg6[%c0_30, %c0_31] : memref<1x32xf32, #tpu.memory_space<vmem>>, vector<1x32xf32>
    %56 = vector.broadcast %55 : vector<1x32xf32> to vector<16x32xf32>
    %57 = arith.addf %49, %56 : vector<16x32xf32>
    %cst_32 = arith.constant 0.000000e+00 : f32
    %58 = vector.broadcast %cst_32 : f32 to vector<16x32xf32>
    %59 = arith.maximumf %57, %58 : vector<16x32xf32>
    %60 = vector.broadcast %54 : vector<16x1xf32> to vector<16x32xf32>
    %61 = arith.mulf %59, %60 : vector<16x32xf32>
    %cst_33 = arith.constant dense<0.000000e+00> : vector<32xf32>
    %62 = vector.multi_reduction <add>, %61, %cst_33 [0] : vector<16x32xf32> to vector<32xf32>
    %63 = vector.shape_cast %62 : vector<32xf32> to vector<1x32xf32>
    %cst_34 = arith.constant 0.111111112 : f32
    %64 = vector.broadcast %cst_34 : f32 to vector<1x32xf32>
    %65 = arith.mulf %63, %64 : vector<1x32xf32>
    %66 = vector.broadcast %65 : vector<1x32xf32> to vector<16x32xf32>
    %67 = arith.subf %61, %66 : vector<16x32xf32>
    %68 = vector.broadcast %54 : vector<16x1xf32> to vector<16x32xf32>
    %69 = arith.mulf %67, %68 : vector<16x32xf32>
    %70 = arith.mulf %69, %69 : vector<16x32xf32>
    %cst_35 = arith.constant dense<0.000000e+00> : vector<32xf32>
    %71 = vector.multi_reduction <add>, %70, %cst_35 [0] : vector<16x32xf32> to vector<32xf32>
    %72 = vector.shape_cast %71 : vector<32xf32> to vector<1x32xf32>
    %cst_36 = arith.constant 1.250000e-01 : f32
    %73 = vector.broadcast %cst_36 : f32 to vector<1x32xf32>
    %74 = arith.mulf %72, %73 : vector<1x32xf32>
    %75 = math.sqrt %74 : vector<1x32xf32>
    %cst_37 = arith.constant dense<0xFF800000> : vector<32xf32>
    %76 = vector.multi_reduction <maximumf>, %61, %cst_37 [0] : vector<16x32xf32> to vector<32xf32>
    %77 = vector.shape_cast %76 : vector<32xf32> to vector<1x32xf32>
    %cst_38 = arith.constant 0.000000e+00 : f32
    %78 = vector.broadcast %cst_38 : f32 to vector<1x32xf32>
    %79 = tpu.concatenate %75, %65, %77, %78 in 1 : vector<1x32xf32>, vector<1x32xf32>, vector<1x32xf32>, vector<1x32xf32> -> vector<1x128xf32>
    %c0_39 = arith.constant 0 : index
    %c0_40 = arith.constant 0 : index
    %c0_41 = arith.constant 0 : index
    %80 = vector.load %arg7[%c0_39, %c0_40, %c0_41] : memref<1x1x128xf32, #tpu.memory_space<vmem>>, vector<1x1x128xf32>
    %81 = vector.shape_cast %80 : vector<1x1x128xf32> to vector<1x128xf32>
    %82 = vector.shape_cast %79 : vector<1x128xf32> to vector<1x1x128xf32>
    tpu.vector_store %arg7[%c0_39, %c0_40, %c0_41], %82 {strides = array<i32>} : memref<1x1x128xf32, #tpu.memory_space<vmem>>, vector<1x1x128xf32>,
    return
  }
  func.func @transform_0(%arg0: i32) -> (i32, i32, i32) {
    %c0_i32 = arith.constant 0 : i32
    %c0_i32_0 = arith.constant 0 : i32
    %c0_i32_1 = arith.constant 0 : i32
    return %arg0, %c0_i32, %c0_i32_0 : i32, i32, i32
  }
  func.func @transform_1(%arg0: i32) -> (i32, i32) {
    %c0_i32 = arith.constant 0 : i32
    %c0_i32_0 = arith.constant 0 : i32
    %c0_i32_1 = arith.constant 0 : i32
    return %c0_i32, %c0_i32_0 : i32, i32
  }
  func.func @transform_2(%arg0: i32) -> (i32, i32) {
    %c0_i32 = arith.constant 0 : i32
    %c0_i32_0 = arith.constant 0 : i32
    %c0_i32_1 = arith.constant 0 : i32
    return %c0_i32, %c0_i32_0 : i32, i32
  }
  func.func @transform_3(%arg0: i32) -> (i32, i32) {
    %c0_i32 = arith.constant 0 : i32
    %c0_i32_0 = arith.constant 0 : i32
    %c0_i32_1 = arith.constant 0 : i32
    return %c0_i32, %c0_i32_0 : i32, i32
  }
  func.func @transform_4(%arg0: i32) -> (i32, i32) {
    %c0_i32 = arith.constant 0 : i32
    %c0_i32_0 = arith.constant 0 : i32
    %c0_i32_1 = arith.constant 0 : i32
    return %c0_i32, %c0_i32_0 : i32, i32
  }
  func.func @transform_5(%arg0: i32) -> (i32, i32) {
    %c0_i32 = arith.constant 0 : i32
    %c0_i32_0 = arith.constant 0 : i32
    %c0_i32_1 = arith.constant 0 : i32
    return %c0_i32, %c0_i32_0 : i32, i32
  }
  func.func @transform_6(%arg0: i32) -> (i32, i32, i32) {
    %c0_i32 = arith.constant 0 : i32
    %c0_i32_0 = arith.constant 0 : i32
    %c0_i32_1 = arith.constant 0 : i32
    return %arg0, %c0_i32, %c0_i32_0 : i32, i32, i32
  }
}

</mosaic_0001>

<bundles_post_ra>
// kernel: encoder_forward.1
= control target key start
LH: loop header
LB: loop body
LE: loop exit
PB: predicated region body
PF: predicated region fallthrough
CT: control target
= control target key end

     0   :  { %11 = vsyncpa [#allocation3], 0  ;;  %s2090_s0 = inlined_call_operand.vmem [shape: bf16[2,40,147], index: 0, kind: input, shape index: {}]   ;;  %s2091_s1 = inlined_call_operand.vmem [shape: bf16[147,32], index: 1, kind: input, shape index: {}]   ;;  %s2092_s2 = inlined_call_operand.vmem [shape: f32[1,32], index: 2, kind: input, shape index: {}]   ;;  %s2093_s3 = inlined_call_operand.vmem [shape: bf16[144,40], index: 3, kind: input, shape index: {}]   ;;  %s2094_s4 = inlined_call_operand.vmem [shape: bf16[288,32], index: 4, kind: input, shape index: {}]   ;;  %s2095_s5 = inlined_call_operand.vmem [shape: f32[1,32], index: 5, kind: input, shape index: {}]   ;;  %s2096_s6 = inlined_call_operand.hbm [shape: f32[2,1,128], index: 6, kind: output, shape index: {}]  }
   0x1   :  { %13 = vsyncpa [#allocation3 + $0x1], 0  ;;  %s1780_s21 = smov 0   ;;  %s1782_s22 = smov 0  }
   0x2   :  { %s1784_s23 = smov 0   ;;  %s1786_s24 = smov 0  }
   0x3 LB: > { %s1801_s25 = sadd.s32 4294967295, %s1736_s24   ;;  %s1353_s26 = sadd.s32 4294967294, %s1736_s24   ;;  %s1736_s24 = sphi %s1786_s24, %s2102_s24   ;;  %s1732_s23 = sphi %s1784_s23, %s2101_s23   ;;  %s1728_s22 = sphi %s1782_s22, %s2100_s22   ;;  %s1724_s21 = sphi %s1780_s21, %s2099_s21  }
   0x4   : > { %s1805_s27 = sadd.s32 1, %s1736_s24   ;;  %s157_s28 = sadd.s32 1, %s1732_s23 }
   0x5   : > { %s154_s29 = ssub.s32 %s1736_s24, %s1805_s27  ;;  %p167_p0 = scmp.ne.s32.totalorder %s1732_s23, %s1728_s22 }
   0x6   : > { %p155_p1 = scmp.eq.s32.totalorder %s154_s29, 0  ;;  %p168_p2 = scmp.eq.s32.totalorder %s1801_s25, 1 }
   0x7   : > { %p173_p3 = scmp.ne.s32.totalorder %s1728_s22, %s1724_s21  ;;  %p174_p4 = scmp.eq.s32.totalorder %s1353_s26, 1 }
   0x8   : > { %s1816_s30 = scalar_select %p155_p1, %s1732_s23, %s157_s28  }
   0x9   : > { %p1818_p5 = por %p168_p2, %p167_p0  ;;  %p1822_p6 = por %p174_p4, %p173_p3 }
   0xa   : > { %p1356_p7 = scmp.ge.s32.totalorder %s1736_s24, 1  ;;  %p215_p8 = scmp.lt.s32.totalorder %s1736_s24, 3 }
   0xc   : > { %p216_p9 = pnand %p1356_p7, %p215_p8 }
   0xd   : > { %v1627_v0 = vld [vmem:[%s2091_s1] sm:$0xff] (!%p216_p9)   ;;  %v1738_v1 = vmov (!%p216_p9), 0   ;;  %v1628_v2 = vld [vmem:[%s2091_s1 + $0x8] sm:$0xff] (!%p216_p9)   ;;  %v1629_v3 = vld [vmem:[%s2091_s1 + $0x10] sm:$0xff] (!%p216_p9)   ;;  %p244_p10 = scmp.lt.s32.totalorder (!%p216_p9), %s1801_s25, 1  ;;  %vm372_vm0 = vcmask (!%p216_p9), 1040384  }
   0xe   : > { %219 = sbr.rel (%p216_p9) target bundleno = 946 (0x3b2), region = 44  ;;  %379 = vmatprep.subr.bf16.mxu0 (!%p216_p9), %v1738_v1  ;;  %v1630_v4 = vld [vmem:[%s2091_s1 + $0x18] sm:$0xff] (!%p216_p9)   ;;  %v1631_v5 = vld [vmem:[%s2091_s1 + $0x20] sm:$0xff] (!%p216_p9)   ;;  %vm362_vm1 = vcmask (!%p216_p9), 154624   ;;  %v1739_v7 = vmov (!%p216_p9), 65535   ;;  %v1632_v9 = vld [vmem:[%s2091_s1 + $0x28] sm:$0xff] (!%p216_p9)  }
   0xf   : > { %380 = vmatpush1.bf16.msra.mxu0 (!%p216_p9), %v1627_v0  ;;  %v374_v8 = vsel (!%p216_p9), %vm372_vm0, 4294967295, %v1739_v7  ;;  %v1633_v10 = vld [vmem:[%s2091_s1 + $0x30] sm:$0xff] (!%p216_p9)   ;;  %vm373_vm2 = vcmask (!%p216_p9), 1041408   ;;  %v1634_v11 = vld [vmem:[%s2091_s1 + $0x38] sm:$0xff] (!%p216_p9)   ;;  %v1635_v12 = vld [vmem:[%s2091_s1 + $0x40] sm:$0xff] (!%p216_p9)   ;;  %v1740_v22 = vmov (!%p216_p9), 0.0  }
  0x10   : > { %381 = vmatprep.subr.bf16.mxu0 (!%p216_p9), %v1738_v1  ;;  %v1636_v13 = vld [vmem:[%s2091_s1 + $0x48] ss:$0 sps:$4 sm:$0x33] (!%p216_p9)   ;;  %v375_v14 = vsel (!%p216_p9), %vm373_vm2, %v374_v8, 0  ;;  %1467 = vmatprep.subr.bf16.mxu1 (!%p216_p9), %v1740_v22  ;;  %vm1741_vm3 = vmmov (!%p216_p9), 0   ;;  %vm534_vm4 = vcmask (!%p216_p9), 1043456  }
  0x11   : > { %v377_v15 = vand.u32 (!%p216_p9), %v1636_v13, %v375_v14  ;;  %1473 = vmatprep.mubr.msk.bf16.mxu1 (!%p216_p9), %vm1741_vm3, %v1740_v22  ;;  %v1358_v23 = vld [vmem:[%s2092_s2] ss:$0 sm:$0xff] (!%p216_p9)  ;;  %vm506_vm5 = vcmask (!%p216_p9), 326656   ;;  %v1654_v51 = vld [vmem:[%s2094_s4 + $0x30] sm:$0xff] (!%p216_p9)   ;;  %v1646_v52 = vld [vmem:[%s2093_s3 + $0x8] sm:$0xff] (!%p216_p9)   ;;  %vm672_vm6 = vcmask (!%p216_p9), 261120  }
  0x12   : > { %v1645_v50 = vld [vmem:[%s2093_s3] sm:$0xff] (!%p216_p9)   ;;  %v1647_v53 = vld [vmem:[%s2093_s3 + $0x10] sm:$0xff] (!%p216_p9)   ;;  %v1648_v54 = vld [vmem:[%s2093_s3 + $0x18] sm:$0xff] (!%p216_p9)   ;;  %s1742_s17 = smov (!%p216_p9), 32   ;;  %s242_s19 = sand.u32 (!%p216_p9), 1, %s1728_s22   ;;  %vm1280_vm10 = vcmask (!%p216_p9), 523264  }
  0x13   : > { %382 = vmatpush1.bf16.msra.mxu0 (!%p216_p9), %v1628_v2  ;;  %v1649_v55 = vld [vmem:[%s2093_s3 + $0x20] sm:$0xff] (!%p216_p9)   ;;  %v1650_v56 = vld [vmem:[%s2093_s3 + $0x28] sm:$0xff] (!%p216_p9)   ;;  %v1651_v57 = vld [vmem:[%s2093_s3 + $0x30] sm:$0xff] (!%p216_p9)   ;;  %s1425_s20 = sshll.u32 (!%p216_p9), %s1801_s25, 4  ;;  %vm1282_vm11 = vcmask (!%p216_p9), 785408   ;;  %s1744_s12 = smov (!%p216_p9), [#allocation2]  }
  0x14   : > { %383 = vmatprep.subr.bf16.mxu0 (!%p216_p9), %v1738_v1  ;;  %v1652_v58 = vld [vmem:[%s2093_s3 + $0x38] sm:$0xff] (!%p216_p9)   ;;  %v1653_v59 = vld [vmem:[%s2093_s3 + $0x40] sm:$0xff] (!%p216_p9)   ;;  %v1655_v60 = vld [vmem:[%s2094_s4 + $0x10] sm:$0xff] (!%p216_p9)   ;;  %s2048_s10 = scalar_lea.hbm (!%p216_p9), %s2096_s6, %s1425_s20  ;;  %s1678_s13 = sshll.u32 (!%p216_p9), %s1744_s12, 4  ;;  %s1679_s13 = int_to_ptr.vmem [resolvable:$false] %s1678_s13 }
  0x15   : > { %s245_s15 = scalar_select %p244_p10, %s1801_s25, 1  ;;  %v1656_v61 = vld [vmem:[%s2094_s4 + $0x18] sm:$0xff]   ;;  %v1657_v7 = vld [vmem:[%s2094_s4] sm:$0xff]  }
  0x16   : > { %v1658_v62 = vld [vmem:[%s2094_s4 + $0x38] sm:$0xff]   ;;  %v1660_v14 = vld [vmem:[%s2094_s4 + $0x20] sm:$0xff]   ;;  %s1286_s25 = scalar_lea.sflag [#allocation3], %s242_s19  ;;  %s1680_s14 = scalar_lea.vmem %s1679_s13, 32 }
  0x17   : > { %384 = vmatpush1.bf16.msra.mxu0 %v1629_v3  ;;  %s1581_s18 = smul.u32 40, %s245_s15 }
  0x18   : > { %385 = vmatprep.subr.bf16.mxu0 %v1738_v1 }
  0x19   : > { %s1845_s26 = scalar_lea.vmem %s2090_s0, %s1581_s18  ;;  %s1743_s18 = smov 64  }
  0x1a   : > { %v1639_v6 = vld [vmem:[%s1845_s26 + $0x4] ss:$8 sps:$4 sm:$0xff]   ;;  %v1637_v16 = vld [vmem:[%s1845_s26] ss:$8 sps:$4 sm:$0xff]   ;;  %v1640_v17 = vld [vmem:[%s1845_s26 + $0x14] ss:$8 sps:$4 sm:$0xff]  }
  0x1b   : > { %386 = vmatpush1.bf16.msra.mxu0 %v1630_v4  ;;  %1375 = vmatprep.mubr.msk.bf16.mxu0 %vm362_vm1, %v1639_v6  ;;  %v254_v18 = vld [vmem:[%s1845_s26 + $0x20] sm:$0xff]  ;;  %v1642_v19 = vld [vmem:[%s1845_s26 + $0x10] ss:$8 sps:$4 sm:$0xff]   ;;  %s243_s26 = scalar_lea.vmem [#allocation2], %s242_s19 }
  0x1c   : > { %387 = vmatprep.subr.bf16.mxu0 %v1738_v1  ;;  %v1364_v20 = vcombine.high %v254_v18, %v254_v18  ;;  %v1363_v21 = vcombine.low %v254_v18, %v254_v18  ;;  %s1298_s28 = sshll.u32 %s243_s26, 4  ;;  %s2050_s28 = int_to_ptr.vmem [resolvable:$true] %s1298_s28 }
  0x1d   : > { %s1674_s11 = scalar_lea.vmem %s2050_s28, 16  ;;  %p1681_p0 = scmp.lt.s32.totalorder %s2050_s28, %s1679_s13 }
  0x1e   : > { %p1675_p11 = scmp.ne.s32.totalorder %s2050_s28, %s1674_s11  ;;  %p1682_p1 = scmp.lt.s32.totalorder %s1680_s14, %s1674_s11 }
  0x1f   : > { %388 = vmatpush1.bf16.msra.mxu0 %v1631_v5 }
  0x20   : > { %389 = vmatprep.subr.bf16.mxu0 %v1738_v1  ;;  %p1676_p12 = pnand %p1675_p11, %p1818_p5  ;;  %p1683_p2 = por %p1682_p1, %p1681_p0 }
  0x22   : > { %p1677_p13 = pneg %p1676_p12 }
  0x23   : > { %390 = vmatpush1.bf16.msra.mxu0 %v1632_v9 }
  0x24   : > { %391 = vmatprep.subr.bf16.mxu0 %v1738_v1  ;;  %p1684_p3 = pnand %p1683_p2, %p1677_p13 }
  0x27   : > { %392 = vmatpush1.bf16.msra.mxu0 %v1633_v10  ;;  %v1659_v10 = vld [vmem:[%s2094_s4 + $0x8] sm:$0xff]  }
  0x28   : > { %393 = vmatprep.subr.bf16.mxu0 %v1738_v1 }
  0x2b   : > { %394 = vmatpush1.bf16.msra.mxu0 %v1634_v11 }
  0x2c   : > { %395 = vmatprep.subr.bf16.mxu0 %v1738_v1 }
  0x2f   : > { %396 = vmatpush1.bf16.msra.mxu0 %v1635_v12 }
  0x30   : > { %397 = vmatprep.subr.bf16.mxu0 %v1738_v1 }
  0x33   : > { %398 = vmatpush1.bf16.msra.mxu0 %v377_v15 }
  0x34   : > { %1509 = vmatprep.subr.bf16.mxu0 %v1740_v22 }
  0x36   : > { %412 = vmatmul.mubr.bf16.vlgmr.msra.gmra.mrb[0].mxu0 %v1637_v16 }
  0x37   : > { %1376 = vmatprep.mubr.msk.bf16.mxu0 %vm362_vm1, %v1640_v17  ;;  %1510 = vmatpush3.bf16.msra.mxu0 %v1655_v60  ;;  %v1661_v17 = vld [vmem:[%s2094_s4 + $0x28] sm:$0xff]  }
  0x38   : > { %1511 = vmatprep.subr.bf16.mxu0 %v1740_v22 }
  0x3b   : > { %1512 = vmatpush3.bf16.msra.mxu0 %v1656_v61 }
  0x3c   : > { %1517 = vmatprep.subr.bf16.mxu0 %v1740_v22 }
  0x3e   : > { %420 = vmatmul.mubr.bf16.gmra.mrb[4].mxu0 %v1642_v19 }
  0x3f   : > { %1377 = vmatprep.mubr.msk.bf16.mxu0 %vm362_vm1, %v1364_v20 }
  0x46   : > { %428 = vmatmul.mubr.bf16.gmra.mrb[8].mxu0 %v1363_v21  ;;  %v1662_v21 = vld [vmem:[%s2094_s4 + $0x40] sm:$0xff]  }
  0x47   : > { %1513 = vmatprep.mubr.msk.bf16.mxu0 %vm1741_vm3, %v1740_v22 }
 0x109   : > { %v413_v24 = vpop.f32.mrb[0].mxu0 }
 0x10a   : > { %v414_v25 = vadd.f32 %v1358_v23, %v413_v24  ;;  %v415_v26 = vpop.f32.mrb[1].mxu0 }
 0x10b   : > { %v416_v27 = vpop.f32.mrb[2].mxu0  ;;  %v1663_v26 = vld [vmem:[%s2094_s4 + $0x48] sm:$0xff]  }
 0x10c   : > { %v417_v28 = vadd.f32 %v1358_v23, %v416_v27  ;;  %v418_v29 = vpop.f32.mrb[3].mxu0  ;;  %v435_v30 = vmax.f32 %v414_v25, 0.0  ;;  %v1664_v25 = vld [vmem:[%s2094_s4 + $0x50] sm:$0xff]   ;;  %v1665_v27 = vld [vmem:[%s2094_s4 + $0x58] sm:$0xff]  }
 0x10e   : > { %v436_v31 = vmax.f32 %v417_v28, 0.0 }
 0x110   : > { %v440_v32 = vpack.c.bf16 %v436_v31, %v435_v30  ;;  %v1666_v31 = vld [vmem:[%s2094_s4 + $0x60] sm:$0xff]  }
 0x111   : > { %v421_v33 = vpop.f32.mrb[4].mxu0 }
 0x112   : > { %v422_v34 = vadd.f32 %v1358_v23, %v421_v33  ;;  %v423_v35 = vpop.f32.mrb[5].mxu0  ;;  %1468 = vmatpush3.bf16.msra.mxu1 %v440_v32 }
 0x113   : > { %v424_v36 = vpop.f32.mrb[6].mxu0  ;;  %1469 = vmatprep.subr.bf16.mxu1 %v1740_v22 }
 0x114   : > { %v425_v37 = vadd.f32 %v1358_v23, %v424_v36  ;;  %v426_v38 = vpop.f32.mrb[7].mxu0  ;;  %v437_v39 = vmax.f32 %v422_v34, 0.0  ;;  %v1667_v34 = vld [vmem:[%s2094_s4 + $0x68] sm:$0xff]  }
 0x115   : > { %v1668_v38 = vld [vmem:[%s2094_s4 + $0x70] sm:$0xff]  }
 0x116   : > { %v438_v40 = vmax.f32 %v425_v37, 0.0 }
 0x118   : > { %v441_v41 = vpack.c.bf16 %v438_v40, %v437_v39 }
 0x119   : > { %v429_v42 = vpop.f32.mrb[8].mxu0 }
 0x11a   : > { %v430_v43 = vadd.f32 %v1358_v23, %v429_v42  ;;  %v431_v44 = vpop.f32.mrb[9].mxu0  ;;  %1470 = vmatpush3.bf16.msra.mxu1 %v441_v41  ;;  %v1669_v41 = vld [vmem:[%s2094_s4 + $0x78] sm:$0xff]  }
 0x11b   : > { %v432_v45 = vpop.f32.mrb[10].mxu0  ;;  %1471 = vmatprep.subr.bf16.mxu1 %v1740_v22 }
 0x11c   : > { %v439_v46 = vmax.f32 %v430_v43, 0.0  ;;  %v433_v47 = vpop.f32.mrb[11].mxu0  ;;  %v1670_v45 = vld [vmem:[%s2094_s4 + $0x80] sm:$0xff]  }
 0x11e   : > { %v442_v48 = vpack.c.bf16 %v439_v46, %v439_v46 }
 0x120   : > { %v536_v49 = vsel %vm534_vm4, %v442_v48, 0  ;;  %v1671_v48 = vld [vmem:[%s2094_s4 + $0x88] sm:$0xff]  }
 0x121   : > { %1472 = vmatpush3.bf16.msra.mxu1 %v536_v49 }
 0x122   : > { %1533 = vmatprep.subr.bf16.mxu1 %v1740_v22 }
 0x124   : > { %1474 = vmatmul.mubr.msk.bf16.vlgmr.msra.gmra.mrb[0].mxu1 %vm506_vm5, %v1645_v50 }
 0x125   : > { %1477 = vmatprep.mubr.msk.bf16.mxu1 %vm1741_vm3, %v1740_v22  ;;  %1534 = vmatpush3.bf16.msra.mxu1 %v1654_v51 }
 0x126   : > { %1535 = vmatprep.subr.bf16.mxu1 %v1740_v22 }
 0x129   : > { %1536 = vmatpush3.bf16.msra.mxu1 %v1658_v62 }
 0x12a   : > { %1549 = vmatprep.subr.bf16.mxu1 %v1740_v22 }
 0x12c   : > { %1478 = vmatmul.mubr.msk.bf16.gmra.mrb[4].mxu1 %vm506_vm5, %v1646_v52 }
 0x12d   : > { %1481 = vmatprep.mubr.msk.bf16.mxu1 %vm1741_vm3, %v1740_v22 }
 0x134   : > { %1482 = vmatmul.mubr.msk.bf16.gmra.mrb[8].mxu1 %vm506_vm5, %v1647_v53 }
 0x135   : > { %1485 = vmatprep.mubr.msk.bf16.mxu1 %vm1741_vm3, %v1740_v22 }
 0x13c   : > { %1486 = vmatmul.mubr.msk.bf16.gmra.mrb[12].mxu1 %vm506_vm5, %v1648_v54 }
 0x13d   : > { %1489 = vmatprep.mubr.msk.bf16.mxu1 %vm1741_vm3, %v1740_v22 }
 0x144   : > { %1490 = vmatmul.mubr.msk.bf16.gmra.mrb[16].mxu1 %vm506_vm5, %v1649_v55 }
 0x145   : > { %1493 = vmatprep.mubr.msk.bf16.mxu1 %vm1741_vm3, %v1740_v22 }
 0x14c   : > { %1494 = vmatmul.mubr.msk.bf16.gmra.mrb[20].mxu1 %vm506_vm5, %v1650_v56 }
 0x14d   : > { %1497 = vmatprep.mubr.msk.bf16.mxu1 %vm1741_vm3, %v1740_v22 }
 0x154   : > { %1498 = vmatmul.mubr.msk.bf16.gmra.mrb[24].mxu1 %vm506_vm5, %v1651_v57 }
 0x155   : > { %1501 = vmatprep.mubr.msk.bf16.mxu1 %vm1741_vm3, %v1740_v22 }
 0x15c   : > { %1502 = vmatmul.mubr.msk.bf16.gmra.mrb[28].mxu1 %vm506_vm5, %v1652_v58 }
 0x15d   : > { %1505 = vmatprep.mubr.msk.bf16.mxu1 %vm1741_vm3, %v1740_v22 }
 0x164   : > { %1506 = vmatmul.mubr.msk.bf16.gmra.mrb[32].mxu1 %vm506_vm5, %v1653_v59 }
 0x165   : > { %1537 = vmatprep.mubr.msk.bf16.mxu1 %vm1741_vm3, %v1740_v22 }
 0x1f7   : > { %v572_v63 = vpop.f32.mrb[0].mxu1 }
 0x1f8   : > { %v1475_v0 = vpop.f32.mrb[1].mxu1 }
 0x1f9   : > { %v575_v1 = vpop.f32.mrb[2].mxu1 }
 0x1fa   : > { %v643_v2 = vpack.c.bf16 %v575_v1, %v572_v63  ;;  %v1476_v3 = vpop.f32.mrb[3].mxu1 }
 0x1ff   : > { %v580_v4 = vpop.f32.mrb[4].mxu1 }
 0x200   : > { %v1479_v5 = vpop.f32.mrb[5].mxu1 }
 0x201   : > { %v583_v6 = vpop.f32.mrb[6].mxu1 }
 0x202   : > { %v644_v8 = vpack.c.bf16 %v583_v6, %v580_v4  ;;  %v1480_v9 = vpop.f32.mrb[7].mxu1 }
 0x204   : > { %1514 = vmatmul.mubr.msk.bf16.vlgmr.msra.gmra.mrb[12].mxu0 %vm672_vm6, %v644_v8 }
 0x205   : > { %1518 = vmatpush3.bf16.msra.mxu0 %v1657_v7  ;;  %1521 = vmatprep.mubr.msk.bf16.mxu0 %vm1741_vm3, %v1740_v22 }
 0x206   : > { %1519 = vmatprep.subr.bf16.mxu0 %v1740_v22 }
 0x207   : > { %v588_v11 = vpop.f32.mrb[8].mxu1 }
 0x208   : > { %v1483_v12 = vpop.f32.mrb[9].mxu1 }
 0x209   : > { %v591_v13 = vpop.f32.mrb[10].mxu1  ;;  %1520 = vmatpush3.bf16.msra.mxu0 %v1659_v10 }
 0x20a   : > { %v645_v15 = vpack.c.bf16 %v591_v13, %v588_v11  ;;  %v1484_v16 = vpop.f32.mrb[11].mxu1  ;;  %1525 = vmatprep.subr.bf16.mxu0 %v1740_v22 }
 0x20c   : > { %1522 = vmatmul.mubr.msk.bf16.vlgmr.msra.gmra.mrb[16].mxu0 %vm672_vm6, %v643_v2 }
 0x20d   : > { %1526 = vmatpush3.bf16.msra.mxu0 %v1660_v14  ;;  %1529 = vmatprep.mubr.msk.bf16.mxu0 %vm1741_vm3, %v1740_v22 }
 0x20e   : > { %1527 = vmatprep.subr.bf16.mxu0 %v1740_v22 }
 0x20f   : > { %v596_v18 = vpop.f32.mrb[12].mxu1 }
 0x210   : > { %v1487_v19 = vpop.f32.mrb[13].mxu1 }
 0x211   : > { %v599_v20 = vpop.f32.mrb[14].mxu1  ;;  %1528 = vmatpush3.bf16.msra.mxu0 %v1661_v17 }
 0x212   : > { %v646_v23 = vpack.c.bf16 %v599_v20, %v596_v18  ;;  %v1488_v24 = vpop.f32.mrb[15].mxu1  ;;  %1541 = vmatprep.subr.bf16.mxu0 %v1740_v22 }
 0x214   : > { %1530 = vmatmul.mubr.msk.bf16.vlgmr.msra.gmra.mrb[20].mxu0 %vm672_vm6, %v645_v15  ;;  %1538 = vmatmul.mubr.msk.bf16.vlgmr.msra.gmra.mrb[36].mxu1 %vm672_vm6, %v646_v23 }
 0x215   : > { %1542 = vmatpush3.bf16.msra.mxu0 %v1662_v21  ;;  %1545 = vmatprep.mubr.msk.bf16.mxu0 %vm1741_vm3, %v1740_v22 }
 0x216   : > { %1543 = vmatprep.subr.bf16.mxu0 %v1740_v22  ;;  %1550 = vmatpush3.bf16.msra.mxu1 %v1664_v25 }
 0x217   : > { %v604_v28 = vpop.f32.mrb[16].mxu1  ;;  %1551 = vmatprep.subr.bf16.mxu1 %v1740_v22  ;;  %1553 = vmatprep.mubr.msk.bf16.mxu1 %vm1741_vm3, %v1740_v22 }
 0x218   : > { %v1491_v29 = vpop.f32.mrb[17].mxu1 }
 0x219   : > { %v607_v30 = vpop.f32.mrb[18].mxu1  ;;  %1544 = vmatpush3.bf16.msra.mxu0 %v1663_v26 }
 0x21a   : > { %v647_v32 = vpack.c.bf16 %v607_v30, %v604_v28  ;;  %v1492_v33 = vpop.f32.mrb[19].mxu1  ;;  %1552 = vmatpush3.bf16.msra.mxu1 %v1665_v27  ;;  %1557 = vmatprep.subr.bf16.mxu0 %v1740_v22 }
 0x21b   : > { %1565 = vmatprep.subr.bf16.mxu1 %v1740_v22 }
 0x21c   : > { %1546 = vmatmul.mubr.msk.bf16.vlgmr.msra.gmra.mrb[24].mxu0 %vm672_vm6, %v647_v32 }
 0x21d   : > { %1558 = vmatpush3.bf16.msra.mxu0 %v1666_v31  ;;  %1561 = vmatprep.mubr.msk.bf16.mxu0 %vm1741_vm3, %v1740_v22 }
 0x21e   : > { %1559 = vmatprep.subr.bf16.mxu0 %v1740_v22 }
 0x21f   : > { %v612_v35 = vpop.f32.mrb[20].mxu1 }
 0x220   : > { %v1495_v36 = vpop.f32.mrb[21].mxu1 }
 0x221   : > { %v615_v37 = vpop.f32.mrb[22].mxu1  ;;  %1560 = vmatpush3.bf16.msra.mxu0 %v1667_v34  ;;  %v1207_v36 = vlaneseq }
 0x222   : > { %v648_v39 = vpack.c.bf16 %v615_v37, %v612_v35  ;;  %v1496_v40 = vpop.f32.mrb[23].mxu1  ;;  %1573 = vmatprep.subr.bf16.mxu0 %v1740_v22 }
 0x224   : > { %1554 = vmatmul.mubr.msk.bf16.vlgmr.msra.gmra.mrb[40].mxu1 %vm672_vm6, %v648_v39 }
 0x225   : > { %1566 = vmatpush3.bf16.msra.mxu1 %v1668_v38  ;;  %1569 = vmatprep.mubr.msk.bf16.mxu1 %vm1741_vm3, %v1740_v22 }
 0x226   : > { %1567 = vmatprep.subr.bf16.mxu1 %v1740_v22 }
 0x227   : > { %v620_v42 = vpop.f32.mrb[24].mxu1 }
 0x228   : > { %v1499_v43 = vpop.f32.mrb[25].mxu1 }
 0x229   : > { %v623_v44 = vpop.f32.mrb[26].mxu1  ;;  %1568 = vmatpush3.bf16.msra.mxu1 %v1669_v41  ;;  %v1208_v43 = vshrl.u32 %v1207_v36, 7 }
 0x22a   : > { %v649_v46 = vpack.c.bf16 %v623_v44, %v620_v42  ;;  %v1500_v47 = vpop.f32.mrb[27].mxu1 }
 0x22b   : > { %v1209_v44 = vadd.s32 8, %v1208_v43 }
 0x22c   : > { %1562 = vmatmul.mubr.msk.bf16.vlgmr.msra.gmra.mrb[28].mxu0 %vm672_vm6, %v649_v46  ;;  %v1424_v46 = vld [vmem:[%s2095_s5] ss:$0 sm:$0xff] }
 0x22d   : > { %1574 = vmatpush3.bf16.msra.mxu0 %v1670_v45  ;;  %1577 = vmatprep.mubr.msk.bf16.mxu0 %vm1741_vm3, %v1740_v22  ;;  %vm1211_vm7 = vcmp.lt.s32.totalorder %v1209_v44, 9 }
 0x22e   : > { %1575 = vmatprep.subr.bf16.mxu0 %v1740_v22 }
 0x22f   : > { %v628_v49 = vpop.f32.mrb[28].mxu1 }
 0x230   : > { %v1503_v50 = vpop.f32.mrb[29].mxu1 }
 0x231   : > { %v631_v51 = vpop.f32.mrb[30].mxu1  ;;  %1576 = vmatpush3.bf16.msra.mxu0 %v1671_v48 }
 0x232   : > { %v650_v52 = vpack.c.bf16 %v631_v51, %v628_v49  ;;  %v1504_v53 = vpop.f32.mrb[31].mxu1 }
 0x234   : > { %1570 = vmatmul.mubr.msk.bf16.vlgmr.msra.gmra.mrb[44].mxu1 %vm672_vm6, %v650_v52 }
 0x237   : > { %v636_v54 = vpop.f32.mrb[32].mxu1 }
 0x238   : > { %v1507_v55 = vpop.f32.mrb[33].mxu1 }
 0x239   : > { %v639_v56 = vpop.f32.mrb[34].mxu1 }
 0x23a   : > { %v651_v57 = vpack.c.bf16 %v639_v56, %v636_v54  ;;  %v1508_v58 = vpop.f32.mrb[35].mxu1  ;;  %v1423_v54 = vsel %vm1211_vm7, 1.0, %v1740_v22 }
 0x23c   : > { %1578 = vmatmul.mubr.msk.bf16.vlgmr.msra.gmra.mrb[32].mxu0 %vm672_vm6, %v651_v57 }
 0x2d7   : > { %v710_v59 = vpop.f32.mrb[12].mxu0 }
 0x2d8   : > { %v1515_v60 = vpop.f32.mrb[13].mxu0 }
 0x2d9   : > { %v713_v61 = vpop.f32.mrb[14].mxu0 }
 0x2da   : > { %v1516_v62 = vpop.f32.mrb[15].mxu0 }
 0x2df   : > { %v766_v63 = vpop.f32.mrb[16].mxu0 }
 0x2e0   : > { %v767_v0 = vadd.f32 %v766_v63, %v710_v59  ;;  %v1523_v1 = vpop.f32.mrb[17].mxu0 }
 0x2e1   : > { %v769_v2 = vpop.f32.mrb[18].mxu0 }
 0x2e2   : > { %v770_v3 = vadd.f32 %v769_v2, %v713_v61  ;;  %v1524_v4 = vpop.f32.mrb[19].mxu0 }
 0x2e7   : > { %v826_v5 = vpop.f32.mrb[20].mxu0  ;;  %v888_v6 = vpop.f32.mrb[36].mxu1 }
 0x2e8   : > { %v833_v7 = vadd.f32 %v826_v5, %v767_v0  ;;  %v1531_v8 = vpop.f32.mrb[21].mxu0  ;;  %v1539_v9 = vpop.f32.mrb[37].mxu1 }
 0x2e9   : > { %v829_v10 = vpop.f32.mrb[22].mxu0  ;;  %v891_v11 = vpop.f32.mrb[38].mxu1 }
 0x2ea   : > { %v895_v12 = vadd.f32 %v888_v6, %v833_v7  ;;  %v834_v13 = vadd.f32 %v829_v10, %v770_v3  ;;  %v1532_v14 = vpop.f32.mrb[23].mxu0  ;;  %v1540_v15 = vpop.f32.mrb[39].mxu1 }
 0x2ec   : > { %v896_v16 = vadd.f32 %v891_v11, %v834_v13 }
 0x2ef   : > { %v950_v17 = vpop.f32.mrb[24].mxu0 }
 0x2f0   : > { %v957_v18 = vadd.f32 %v950_v17, %v895_v12  ;;  %v1547_v19 = vpop.f32.mrb[25].mxu0 }
 0x2f1   : > { %v953_v20 = vpop.f32.mrb[26].mxu0 }
 0x2f2   : > { %v958_v21 = vadd.f32 %v953_v20, %v896_v16  ;;  %v1548_v23 = vpop.f32.mrb[27].mxu0 }
 0x2f7   : > { %v1012_v24 = vpop.f32.mrb[40].mxu1 }
 0x2f8   : > { %v1019_v25 = vadd.f32 %v1012_v24, %v957_v18  ;;  %v1555_v26 = vpop.f32.mrb[41].mxu1 }
 0x2f9   : > { %v1015_v27 = vpop.f32.mrb[42].mxu1 }
 0x2fa   : > { %v1020_v28 = vadd.f32 %v1015_v27, %v958_v21  ;;  %v1556_v29 = vpop.f32.mrb[43].mxu1 }
 0x2ff   : > { %v1074_v30 = vpop.f32.mrb[28].mxu0 }
 0x300   : > { %v1081_v31 = vadd.f32 %v1074_v30, %v1019_v25  ;;  %v1563_v32 = vpop.f32.mrb[29].mxu0 }
 0x301   : > { %v1077_v33 = vpop.f32.mrb[30].mxu0 }
 0x302   : > { %v1082_v34 = vadd.f32 %v1077_v33, %v1020_v28  ;;  %v1564_v35 = vpop.f32.mrb[31].mxu0 }
 0x307   : > { %v1136_v37 = vpop.f32.mrb[44].mxu1 }
 0x308   : > { %v1143_v38 = vadd.f32 %v1136_v37, %v1081_v31  ;;  %v1571_v39 = vpop.f32.mrb[45].mxu1 }
 0x309   : > { %v1139_v40 = vpop.f32.mrb[46].mxu1 }
 0x30a   : > { %v1144_v41 = vadd.f32 %v1139_v40, %v1082_v34  ;;  %v1572_v42 = vpop.f32.mrb[47].mxu1 }
 0x30f   : > { %v1198_v45 = vpop.f32.mrb[32].mxu0 }
 0x310   : > { %v1205_v47 = vadd.f32 %v1198_v45, %v1143_v38  ;;  %v1579_v48 = vpop.f32.mrb[33].mxu0 }
 0x311   : > { %v1201_v49 = vpop.f32.mrb[34].mxu0 }
 0x312   : > { %v1223_v50 = vadd.f32 %v1424_v46, %v1205_v47  ;;  %v1206_v51 = vadd.f32 %v1201_v49, %v1144_v41  ;;  %v1580_v52 = vpop.f32.mrb[35].mxu0 }
 0x314   : > { %v1224_v53 = vadd.f32 %v1424_v46, %v1206_v51  ;;  %v1225_v55 = vmax.f32 %v1223_v50, 0.0 }
 0x316   : > { %v1226_v56 = vmax.f32 %v1224_v53, 0.0  ;;  %v1229_v58 = vsel %vm672_vm6, %v1225_v55, 0.0  ;;  %v1262_v59 = vsel %vm672_vm6, %v1225_v55, -inf }
 0x318   : > { %v1228_v57 = vmul.f32 %v1423_v54, %v1226_v56 }
 0x31a   : > { %v1230_v60 = vsel %vm672_vm6, %v1228_v57, 0.0  ;;  %v1263_v61 = vsel %vm672_vm6, %v1228_v57, -inf }
 0x31b   : > { %v1231_v62 = vadd.f32 %v1230_v60, %v1229_v58  ;;  %v1264_v63 = vmax.f32 %v1262_v59, %v1263_v61 }
 0x31d   : > { %v1232_v0 = vrot.slane %v1231_v62, 4  ;;  %v1265_v1 = vrot.slane %v1264_v63, 4 }
 0x31f   : > { %v1233_v2 = vadd.f32 %v1232_v0, %v1231_v62  ;;  %v1266_v3 = vmax.f32 %v1264_v63, %v1265_v1 }
 0x321   : > { %v1234_v4 = vrot.slane %v1233_v2, 2  ;;  %v1267_v5 = vrot.slane %v1266_v3, 2 }
 0x323   : > { %v1235_v22 = vadd.f32 %v1234_v4, %v1233_v2  ;;  %v1268_v7 = vmax.f32 %v1266_v3, %v1267_v5 }
 0x325   : > { %v1236_v6 = vrot.slane %v1235_v22, 1  ;;  %v1269_v10 = vrot.slane %v1268_v7, 1 }
 0x327   : > { %v1237_v8 = vadd.f32 %v1236_v6, %v1235_v22  ;;  %v1270_v15 = vmax.f32 %v1268_v7, %v1269_v10 }
 0x329   : > { %v1238_v9 = vmul.f32 0.11111111, %v1237_v8 }
 0x32b   : > { %1272 = vrot.lane.b32.xlu0 %v1238_v9, %s1742_s17  ;;  %v1239_v11 = vsub.f32 %v1225_v55, %v1238_v9  ;;  %v1240_v12 = vsub.f32 %v1228_v57, %v1238_v9 }
 0x32d   : > { %v1242_v13 = vmul.f32 %v1423_v54, %v1240_v12  ;;  %v1243_v14 = vmul.f32 %v1239_v11, %v1239_v11 }
 0x32f   : > { %v1244_v16 = vmul.f32 %v1242_v13, %v1242_v13  ;;  %1276 = vrot.lane.b32.xlu0 %v1270_v15, %s1743_s18  ;;  %v1245_v17 = vsel %vm672_vm6, %v1243_v14, 0.0 }
 0x331   : > { %v1246_v18 = vsel %vm672_vm6, %v1244_v16, 0.0 }
 0x332   : > { %v1247_v19 = vadd.f32 %v1246_v18, %v1245_v17 }
 0x334   : > { %v1248_v20 = vrot.slane %v1247_v19, 4 }
 0x336   : > { %v1249_v21 = vadd.f32 %v1248_v20, %v1247_v19 }
 0x338   : > { %v1250_v23 = vrot.slane %v1249_v21, 2 }
 0x33a   : > { %v1251_v24 = vadd.f32 %v1250_v23, %v1249_v21 }
 0x33c   : > { %v1252_v25 = vrot.slane %v1251_v24, 1 }
 0x33e   : > { %v1253_v26 = vadd.f32 %v1252_v25, %v1251_v24 }
 0x340   : > { %v1254_v27 = vmul.f32 0.125, %v1253_v26 }
 0x342   : > { %1672 = vrsqrt.f32 %v1254_v27  ;;  %vm1257_vm8 = vcmp.eq.f32.partialorder %v1254_v27, inf  ;;  %v1260_v32 = vand.u32 2147483648, %v1254_v27  ;;  %vm1259_vm9 = vcmp.eq.f32.partialorder %v1254_v27, 0.0 }
 0x34c   : > { %v1673_v28 = vpop.eup %1672 }
 0x34d   : > { %v1256_v29 = vmul.f32 %v1673_v28, %v1254_v27 }
 0x34f   : > { %v1258_v31 = vsel %vm1257_vm8, %v1254_v27, %v1256_v29 }
 0x350   : > { %v1261_v33 = vsel %vm1259_vm9, %v1260_v32, %v1258_v31 }
 0x39d   : > { %v1273_v30 = vpop.permute.xlu0 %1272 }
 0x39e   : > { %v1279_v34 = vsel %vm672_vm6, %v1261_v33, %v1273_v30 }
 0x3a1   : > { %v1277_v35 = vpop.permute.xlu0 %1276 }
 0x3a2   : > { %v1281_v36 = vsel %vm1280_vm10, %v1279_v34, %v1277_v35 }
 0x3a3   : > { %v1283_v37 = vsel %vm1282_vm11, %v1281_v36, 0.0 }
 0x3a4   : > { %1284 = vst [vmem:[%s243_s26] sm:$0x1] %v1283_v37 }
 0x3a5   : > { %1687 = shalt.err (!%p1684_p3)
}
 0x3a6   : > { %s1688_s15 = scalar_lea.hbm %s2048_s10, 16  ;;  %s1692_s18 = scalar_lea.hbm %s2096_s6, 32 }
 0x3a7   : > { %p1689_p4 = scmp.ne.s32.totalorder %s2048_s10, %s1688_s15  ;;  %p1693_p9 = scmp.lt.u32.totalorder %s2048_s10, %s2096_s6 }
 0x3a8   : > { %p1694_p10 = scmp.lt.u32.totalorder %s1692_s18, %s1688_s15  ;;  %p1696_p12 = scmp.lt.u32.totalorder %s1688_s15, %s2048_s10 }
 0x3a9   : > { %p1690_p7 = pnand %p1689_p4, %p1818_p5 }
 0x3aa   : > { %p1695_p11 = por %p1694_p10, %p1693_p9 }
 0x3ab   : > { %p1691_p8 = pneg %p1690_p7 }
 0x3ac   : > { %p1697_p13 = por %p1696_p12, %p1695_p11 }
 0x3ae   : > { %p1698_p0 = pnand %p1697_p13, %p1691_p8 }
 0x3b0   : > { %1701 = shalt.err (!%p1698_p0)
}
 0x3b1   : > { %1582 = dma.vmem_to_hbm [thread:$0]  (%p1818_p5), %s2050_s28, 16, %s2048_s10, %s1286_s25  }
 0x3b2 PF: > { %p1588_p1 = scmp.ge.s32.totalorder %s1736_s24, 2  ;;  %s1310_s26 = sand.u32 1, %s1724_s21  }
 0x3b3   : > { %s1311_s29 = scalar_lea.sflag [#allocation3], %s1310_s26 }
 0x3b4   : > { %p1585_p2 = pnand %p1588_p1, %p1822_p6 }
 0x3b6   : > { %1719 = dma.done.wait (!%p1585_p2), %s1311_s29, 16  }
 0x3b7   : > { %1721 = vsyncadd (!%p1585_p2), %s1311_s29, 4294967280  ;;  %p16_p3 = scmp.ge.s32.totalorder %s1805_s27, 4   ;;  %s2099_s21 = smov %s1728_s22 }
 0x3b8   : > { %s2100_s22 = smov %s1732_s23  ;;  %s2101_s23 = smov %s1816_s30 }
 0x3b9   : > { %s2102_s24 = smov %s1805_s27  ;;  %18 = sbr.rel (!%p16_p3) target bundleno = 3 (0x3), region = 79 }
 0x3c0   :  { %1315 = vsyncpa [#allocation3], 1 }
 0x3c1   :  { %1317 = vsyncpa [#allocation3 + $0x1], 1 }

</bundles_post_ra>
